<compile_context>
chip_gen: v7x
topology: tpu7x:2x2x1
jax: 0.10.0
libtpu: 0.0.40
codegen_flags: <defaults>
</compile_context>

<pallas_src>
import jax
import jax.numpy as jnp
import numpy as np
from jax.experimental import pallas as pl
from jax.experimental.pallas import tpu as pltpu

d_q = 16   # query feature dim
d_k = 16   # key feature dim
d_w = 32   # hidden (energy) dim
d_v = 16   # value feature dim


def _round_up(x, m):
    return ((x + m - 1) // m) * m


def _choose_tile_b(B, max_tile=2048):
    """Batch rows per grid step.

    * B <= 16: single full-dim block (satisfies the (8,128) rule via the
      full-dimension exception).
    * otherwise: a multiple of 8 sized so the grid has >= 2 steps (v7x
      megacore sharding), capped so double-buffered dense blocks stay well
      under the scoped VMEM limit on all generations.
    """
    if B <= 16:
        return B
    return min(max_tile, _round_up(pl.cdiv(B, 2), 8))


def _additive_attn_kernel(q_ref, k_ref, v_ref, wq_ref, wk_ref, ws_ref,
                          exp_ref, seg_ref, b_ref, ctx_ref, attn_ref):
    # Per-grid-step refs (TILE_B batch rows, everything lane-dense):
    #   q_ref  : (TILE_B, T*d_q)   query slab
    #   k_ref  : (TILE_B, T*d_k)   key slab
    #   v_ref  : (TILE_B, T*d_v)   value slab
    #   wq_ref : (T*d_q, T*d_w)    block-diagonal, T copies of W1^T
    #   wk_ref : (T*d_k, T*d_w)    block-diagonal, T copies of W2^T
    #   ws_ref : (T*d_w, T)        block-diagonal, T copies of Ws^T (score proj)
    #   exp_ref: (T, T*d_v)        0/1 expansion: attn[b,t] -> d_v lanes of seg t
    #   seg_ref: (T*d_v, d_v)      0/1 segment-sum over t
    #   b_ref  : (1,) f32 in SMEM  additive-energy bias
    #   ctx_ref: (TILE_B, d_v)     context output
    #   attn_ref:(TILE_B, T)       attention weights output
    bias = b_ref[0]

    # Fused projections + tanh on the MXU; h is lane-dense (TILE_B, T*d_w).
    h = jnp.tanh(
        jnp.dot(q_ref[...], wq_ref[...], preferred_element_type=jnp.float32)
        + jnp.dot(k_ref[...], wk_ref[...], preferred_element_type=jnp.float32)
        + bias)

    # Score projection on the (otherwise idle) MXU; Ws is folded into ws_ref.
    # NOTE: score_proj bias bs is intentionally omitted -- softmax is
    # shift-invariant, so it cannot affect either returned output.
    score = jnp.dot(h, ws_ref[...], preferred_element_type=jnp.float32)  # (TB, T)

    # Single, exact softmax (exact division: rows sum to 1 and the context
    # below uses these exact weights -> matches attn @ value bit-for-bit in
    # spirit; the previous approx-reciprocal + duplicated softmax was the
    # source of the >1e-3 context mismatch).
    m = jnp.max(score, axis=-1, keepdims=True)
    e = jnp.exp(score - m)
    denom = jnp.sum(e, axis=-1, keepdims=True)
    attn = e / denom                                                     # (TB, T)
    attn_ref[...] = attn.astype(attn_ref.dtype)

    # context[b, d] = sum_t attn[b, t] * value[b, t, d], done without any
    # lane<->sublane relayout:
    #   expand attn to (TB, T*d_v) with a 0/1 matrix (MXU), multiply the dense
    #   value slab (VPU), segment-sum the T groups of d_v lanes (MXU).
    attn_wide = jnp.dot(attn, exp_ref[...],
                        preferred_element_type=jnp.float32)              # (TB, T*d_v)
    ctx = jnp.dot(attn_wide * v_ref[...], seg_ref[...],
                  preferred_element_type=jnp.float32)                    # (TB, d_v)
    ctx_ref[...] = ctx.astype(ctx_ref.dtype)


def additive_attention(query, key, value, W1, W2, bias, Ws, bs):
    """query:(B,T,d_q)  key:(B,T,d_k)  value:(B,T,d_v)
       W1:(d_w,d_q)  W2:(d_w,d_k)  bias: scalar  Ws:(1,d_w)  bs:(1,)
       returns (context (B,1,d_v), attn (B,T))"""
    B, T, dq = query.shape
    dk = key.shape[-1]
    dv = value.shape[-1]
    dw = W1.shape[0]
    out_dtype = query.dtype

    # Lane-dense slabs: free, contiguous row-major reshapes (no HBM copies).
    q2 = query.reshape(B, T * dq).astype(jnp.float32)
    k2 = key.reshape(B, T * dk).astype(jnp.float32)
    v2 = value.reshape(B, T * dv).astype(jnp.float32)

    # Small constant matrices, built once (a few hundred KB total).
    eye_t = jnp.eye(T, dtype=jnp.float32)
    wq_bd = jnp.kron(eye_t, W1.T.astype(jnp.float32))                 # (T*dq, T*dw)
    wk_bd = jnp.kron(eye_t, W2.T.astype(jnp.float32))                 # (T*dk, T*dw)
    ws_bd = jnp.kron(eye_t, Ws.T.astype(jnp.float32))                 # (T*dw, T)
    exp_m = jnp.kron(eye_t, jnp.ones((1, dv), jnp.float32))           # (T, T*dv)
    seg_m = jnp.tile(jnp.eye(dv, dtype=jnp.float32), (T, 1))          # (T*dv, dv)
    b_arr = jnp.reshape(bias, (1,)).astype(jnp.float32)
    # `bs` is not passed to the kernel: softmax(score + c) == softmax(score),
    # so it has no effect on either returned output.
    del bs

    TILE_B = _choose_tile_b(B)
    grid = (pl.cdiv(B, TILE_B),)

    def const_spec(shape):
        return pl.BlockSpec(shape, lambda i: (0, 0))

    smem_spec = pl.BlockSpec(memory_space=pltpu.MemorySpace.SMEM)

    ctx2d, attn = pl.pallas_call(
        _additive_attn_kernel,
        out_shape=(
            jax.ShapeDtypeStruct((B, dv), out_dtype),
            jax.ShapeDtypeStruct((B, T), out_dtype),
        ),
        grid=grid,
        in_specs=[
            pl.BlockSpec((TILE_B, T * dq), lambda i: (i, 0)),
            pl.BlockSpec((TILE_B, T * dk), lambda i: (i, 0)),
            pl.BlockSpec((TILE_B, T * dv), lambda i: (i, 0)),
            const_spec((T * dq, T * dw)),
            const_spec((T * dk, T * dw)),
            const_spec((T * dw, T)),
            const_spec((T, T * dv)),
            const_spec((T * dv, dv)),
            smem_spec,
        ],
        out_specs=(
            pl.BlockSpec((TILE_B, dv), lambda i: (i, 0)),
            pl.BlockSpec((TILE_B, T), lambda i: (i, 0)),
        ),
        compiler_params=pltpu.CompilerParams(
            dimension_semantics=("parallel",)),
    )(q2, k2, v2, wq_bd, wk_bd, ws_bd, exp_m, seg_m, b_arr)

    context = ctx2d[:, None, :]        # (B, 1, d_v)
    return context, attn


def _reference(query, key, value, W1, W2, bias, Ws, bs):
    hp = jax.lax.Precision.HIGHEST
    h = jnp.tanh(jnp.einsum("btq,wq->btw", query, W1, precision=hp)
                 + jnp.einsum("btk,wk->btw", key, W2, precision=hp)
                 + bias)
    score = jnp.einsum("btw,ow->bto", h, Ws, precision=hp)[..., 0] + bs[0]
    attn = jax.nn.softmax(score, axis=-1)
    context = jnp.einsum("bt,btd->bd", attn, value, precision=hp)[:, None, :]
    return context, attn


def _run_case(B, T, seed=0):
    key0 = jax.random.PRNGKey(seed)
    kq, kk, kv, k1, k2, kb, ks, ksb = jax.random.split(key0, 8)

    query = jax.random.normal(kq, (B, T, d_q), dtype=jnp.float32)
    key_t = jax.random.normal(kk, (B, T, d_k), dtype=jnp.float32)
    value = jax.random.normal(kv, (B, T, d_v), dtype=jnp.float32)

    # Deterministic parameter init (shapes follow nn.Linear(out, in) convention).
    W1 = jax.random.uniform(k1, (d_w, d_q), minval=-0.1, maxval=0.1, dtype=jnp.float32)
    W2 = jax.random.uniform(k2, (d_w, d_k), minval=-0.1, maxval=0.1, dtype=jnp.float32)
    bias = jax.random.uniform(kb, (), minval=-0.1, maxval=0.1, dtype=jnp.float32)
    Ws = jax.random.uniform(ks, (1, d_w), minval=-0.1, maxval=0.1, dtype=jnp.float32)
    bs = jax.random.uniform(ksb, (1,), minval=-0.1, maxval=0.1, dtype=jnp.float32)

    ctx, attn = additive_attention(query, key_t, value, W1, W2, bias, Ws, bs)
    jax.block_until_ready((ctx, attn))

    ctx_ref, attn_ref = _reference(query, key_t, value, W1, W2, bias, Ws, bs)
    np.testing.assert_allclose(np.asarray(attn), np.asarray(attn_ref), rtol=1e-3, atol=1e-3)
    np.testing.assert_allclose(np.asarray(ctx), np.asarray(ctx_ref), rtol=1e-3, atol=1e-3)


if __name__ == "__main__":
    _run_case(B=2, T=8)       # small shape from the spec (single full-dim block)
    _run_case(B=200, T=8)     # two grid steps + masked partial last block
    print("KERNEL_OK")
</pallas_src>

<mosaic_0001>
module attributes {stable_mosaic.version = 11 : i64} {
  func.func @_additive_attn_kernel(%arg0: i32, %arg1: memref<2x128xf32, #tpu.memory_space<vmem>>, %arg2: memref<2x128xf32, #tpu.memory_space<vmem>>, %arg3: memref<2x128xf32, #tpu.memory_space<vmem>>, %arg4: memref<128x256xf32, #tpu.memory_space<vmem>>, %arg5: memref<128x256xf32, #tpu.memory_space<vmem>>, %arg6: memref<256x8xf32, #tpu.memory_space<vmem>>, %arg7: memref<8x128xf32, #tpu.memory_space<vmem>>, %arg8: memref<128x16xf32, #tpu.memory_space<vmem>>, %arg9: memref<1xf32, #tpu.memory_space<smem>>, %arg10: memref<2x16xf32, #tpu.memory_space<vmem>>, %arg11: memref<2x8xf32, #tpu.memory_space<vmem>>) attributes {dimension_semantics = [#tpu.dimension_semantics<parallel>], iteration_bounds = array<i64: 1>, scalar_prefetch = 0 : i64, scratch_operands = 0 : i64, tpu.core_type = #tpu.core_type<tc>, window_params = [{transform_indices = @transform_0, window_bounds = array<i64: 2, 128>}, {transform_indices = @transform_1, window_bounds = array<i64: 2, 128>}, {transform_indices = @transform_2, window_bounds = array<i64: 2, 128>}, {pipeline_mode = #tpu.pipeline_mode<synchronous>, transform_indices = @transform_3, window_bounds = array<i64: 128, 256>}, {pipeline_mode = #tpu.pipeline_mode<synchronous>, transform_indices = @transform_4, window_bounds = array<i64: 128, 256>}, {pipeline_mode = #tpu.pipeline_mode<synchronous>, transform_indices = @transform_5, window_bounds = array<i64: 256, 8>}, {pipeline_mode = #tpu.pipeline_mode<synchronous>, transform_indices = @transform_6, window_bounds = array<i64: 8, 128>}, {pipeline_mode = #tpu.pipeline_mode<synchronous>, transform_indices = @transform_7, window_bounds = array<i64: 128, 16>}, {transform_indices = @transform_8, window_bounds = array<i64: 1>}, {transform_indices = @transform_9, window_bounds = array<i64: 2, 16>}, {transform_indices = @transform_10, window_bounds = array<i64: 2, 8>}]} {
    %c0 = arith.constant 0 : index
    %0 = memref.load %arg9[%c0] : memref<1xf32, #tpu.memory_space<smem>>
    %c0_0 = arith.constant 0 : index
    %c0_1 = arith.constant 0 : index
    %1 = vector.load %arg1[%c0_0, %c0_1] : memref<2x128xf32, #tpu.memory_space<vmem>>, vector<2x128xf32>
    %c0_2 = arith.constant 0 : index
    %c0_3 = arith.constant 0 : index
    %2 = vector.load %arg4[%c0_2, %c0_3] : memref<128x256xf32, #tpu.memory_space<vmem>>, vector<128x256xf32>
    %cst = arith.constant dense<0.000000e+00> : vector<2x256xf32>
    %3 = tpu.matmul %1, %2, %cst {dimension_numbers = #tpu.dot_dimension_numbers<[1], [0], [0], [1], [0, 0, 1, 1], [], []>} : vector<2x128xf32>, vector<128x256xf32>, vector<2x256xf32> -> vector<2x256xf32>
    %c0_4 = arith.constant 0 : index
    %c0_5 = arith.constant 0 : index
    %4 = vector.load %arg2[%c0_4, %c0_5] : memref<2x128xf32, #tpu.memory_space<vmem>>, vector<2x128xf32>
    %c0_6 = arith.constant 0 : index
    %c0_7 = arith.constant 0 : index
    %5 = vector.load %arg5[%c0_6, %c0_7] : memref<128x256xf32, #tpu.memory_space<vmem>>, vector<128x256xf32>
    %cst_8 = arith.constant dense<0.000000e+00> : vector<2x256xf32>
    %6 = tpu.matmul %4, %5, %cst_8 {dimension_numbers = #tpu.dot_dimension_numbers<[1], [0], [0], [1], [0, 0, 1, 1], [], []>} : vector<2x128xf32>, vector<128x256xf32>, vector<2x256xf32> -> vector<2x256xf32>
    %7 = arith.addf %3, %6 : vector<2x256xf32>
    %8 = vector.broadcast %0 : f32 to vector<2x256xf32>
    %9 = arith.addf %7, %8 : vector<2x256xf32>
    %10 = math.tanh %9 : vector<2x256xf32>
    %c0_9 = arith.constant 0 : index
    %c0_10 = arith.constant 0 : index
    %11 = vector.load %arg6[%c0_9, %c0_10] : memref<256x8xf32, #tpu.memory_space<vmem>>, vector<256x8xf32>
    %cst_11 = arith.constant dense<0.000000e+00> : vector<2x8xf32>
    %12 = tpu.matmul %10, %11, %cst_11 {dimension_numbers = #tpu.dot_dimension_numbers<[1], [0], [0], [1], [0, 0, 1, 1], [], []>} : vector<2x256xf32>, vector<256x8xf32>, vector<2x8xf32> -> vector<2x8xf32>
    %cst_12 = arith.constant dense<0xFF800000> : vector<2xf32>
    %13 = vector.multi_reduction <maximumf>, %12, %cst_12 [1] : vector<2x8xf32> to vector<2xf32>
    %14 = vector.shape_cast %13 : vector<2xf32> to vector<2x1xf32>
    %15 = vector.broadcast %14 : vector<2x1xf32> to vector<2x8xf32>
    %16 = arith.subf %12, %15 : vector<2x8xf32>
    %17 = math.exp %16 : vector<2x8xf32>
    %cst_13 = arith.constant dense<0.000000e+00> : vector<2xf32>
    %18 = vector.multi_reduction <add>, %17, %cst_13 [1] : vector<2x8xf32> to vector<2xf32>
    %19 = vector.shape_cast %18 : vector<2xf32> to vector<2x1xf32>
    %20 = vector.broadcast %19 : vector<2x1xf32> to vector<2x8xf32>
    %21 = arith.divf %17, %20 : vector<2x8xf32>
    %c0_14 = arith.constant 0 : index
    %c0_15 = arith.constant 0 : index
    %22 = vector.load %arg11[%c0_14, %c0_15] : memref<2x8xf32, #tpu.memory_space<vmem>>, vector<2x8xf32>
    tpu.vector_store %arg11[%c0_14, %c0_15], %21 {strides = array<i32>} : memref<2x8xf32, #tpu.memory_space<vmem>>, vector<2x8xf32>,
    %c0_16 = arith.constant 0 : index
    %c0_17 = arith.constant 0 : index
    %23 = vector.load %arg7[%c0_16, %c0_17] : memref<8x128xf32, #tpu.memory_space<vmem>>, vector<8x128xf32>
    %cst_18 = arith.constant dense<0.000000e+00> : vector<2x128xf32>
    %24 = tpu.matmul %21, %23, %cst_18 {dimension_numbers = #tpu.dot_dimension_numbers<[1], [0], [0], [1], [0, 0, 1, 1], [], []>} : vector<2x8xf32>, vector<8x128xf32>, vector<2x128xf32> -> vector<2x128xf32>
    %c0_19 = arith.constant 0 : index
    %c0_20 = arith.constant 0 : index
    %25 = vector.load %arg3[%c0_19, %c0_20] : memref<2x128xf32, #tpu.memory_space<vmem>>, vector<2x128xf32>
    %26 = arith.mulf %24, %25 : vector<2x128xf32>
    %c0_21 = arith.constant 0 : index
    %c0_22 = arith.constant 0 : index
    %27 = vector.load %arg8[%c0_21, %c0_22] : memref<128x16xf32, #tpu.memory_space<vmem>>, vector<128x16xf32>
    %cst_23 = arith.constant dense<0.000000e+00> : vector<2x16xf32>
    %28 = tpu.matmul %26, %27, %cst_23 {dimension_numbers = #tpu.dot_dimension_numbers<[1], [0], [0], [1], [0, 0, 1, 1], [], []>} : vector<2x128xf32>, vector<128x16xf32>, vector<2x16xf32> -> vector<2x16xf32>
    %c0_24 = arith.constant 0 : index
    %c0_25 = arith.constant 0 : index
    %29 = vector.load %arg10[%c0_24, %c0_25] : memref<2x16xf32, #tpu.memory_space<vmem>>, vector<2x16xf32>
    tpu.vector_store %arg10[%c0_24, %c0_25], %28 {strides = array<i32>} : memref<2x16xf32, #tpu.memory_space<vmem>>, vector<2x16xf32>,
    return
  }
  func.func @transform_0(%arg0: i32) -> (i32, i32) {
    %c0_i32 = arith.constant 0 : i32
    %c0_i32_0 = arith.constant 0 : i32
    return %arg0, %c0_i32 : i32, i32
  }
  func.func @transform_1(%arg0: i32) -> (i32, i32) {
    %c0_i32 = arith.constant 0 : i32
    %c0_i32_0 = arith.constant 0 : i32
    return %arg0, %c0_i32 : i32, i32
  }
  func.func @transform_2(%arg0: i32) -> (i32, i32) {
    %c0_i32 = arith.constant 0 : i32
    %c0_i32_0 = arith.constant 0 : i32
    return %arg0, %c0_i32 : i32, i32
  }
  func.func @transform_3(%arg0: i32) -> (i32, i32) {
    %c0_i32 = arith.constant 0 : i32
    %c0_i32_0 = arith.constant 0 : i32
    %c0_i32_1 = arith.constant 0 : i32
    return %c0_i32, %c0_i32_0 : i32, i32
  }
  func.func @transform_4(%arg0: i32) -> (i32, i32) {
    %c0_i32 = arith.constant 0 : i32
    %c0_i32_0 = arith.constant 0 : i32
    %c0_i32_1 = arith.constant 0 : i32
    return %c0_i32, %c0_i32_0 : i32, i32
  }
  func.func @transform_5(%arg0: i32) -> (i32, i32) {
    %c0_i32 = arith.constant 0 : i32
    %c0_i32_0 = arith.constant 0 : i32
    %c0_i32_1 = arith.constant 0 : i32
    return %c0_i32, %c0_i32_0 : i32, i32
  }
  func.func @transform_6(%arg0: i32) -> (i32, i32) {
    %c0_i32 = arith.constant 0 : i32
    %c0_i32_0 = arith.constant 0 : i32
    %c0_i32_1 = arith.constant 0 : i32
    return %c0_i32, %c0_i32_0 : i32, i32
  }
  func.func @transform_7(%arg0: i32) -> (i32, i32) {
    %c0_i32 = arith.constant 0 : i32
    %c0_i32_0 = arith.constant 0 : i32
    %c0_i32_1 = arith.constant 0 : i32
    return %c0_i32, %c0_i32_0 : i32, i32
  }
  func.func @transform_8(%arg0: i32) -> i32 {
    %c0_i32 = arith.constant 0 : i32
    %c0_i32_0 = arith.constant 0 : i32
    return %c0_i32 : i32
  }
  func.func @transform_9(%arg0: i32) -> (i32, i32) {
    %c0_i32 = arith.constant 0 : i32
    %c0_i32_0 = arith.constant 0 : i32
    return %arg0, %c0_i32 : i32, i32
  }
  func.func @transform_10(%arg0: i32) -> (i32, i32) {
    %c0_i32 = arith.constant 0 : i32
    %c0_i32_0 = arith.constant 0 : i32
    return %arg0, %c0_i32 : i32, i32
  }
}

</mosaic_0001>

<bundles_post_ra>
// kernel: tpu_custom_call.1
= control target key start
LH: loop header
LB: loop body
LE: loop exit
PB: predicated region body
PF: predicated region fallthrough
CT: control target
= control target key end

     0   :  { %17 = vsyncpa [#allocation4], 0  ;;  %s1243_s0 = inlined_call_operand.vmem [shape: f32[2,128], index: 0, kind: input, shape index: {}]   ;;  %s1244_s1 = inlined_call_operand.vmem [shape: f32[2,128], index: 1, kind: input, shape index: {}]   ;;  %s1245_s2 = inlined_call_operand.vmem [shape: f32[2,128], index: 2, kind: input, shape index: {}]   ;;  %s1246_s3 = inlined_call_operand.vmem [shape: f32[128,256], index: 3, kind: input, shape index: {}]   ;;  %s1247_s4 = inlined_call_operand.hbm [shape: f32[128,256], index: 4, kind: input, shape index: {}]   ;;  %s1248_s5 = inlined_call_operand.vmem [shape: f32[256,8], index: 5, kind: input, shape index: {}]   ;;  %s1249_s6 = inlined_call_operand.vmem [shape: f32[8,128], index: 6, kind: input, shape index: {}]   ;;  %s1250_s7 = inlined_call_operand.vmem [shape: f32[128,16], index: 7, kind: input, shape index: {}]   ;;  %s1251_s8 = inlined_call_operand.<no memory space> [shape: f32[1], index: 8, kind: input, shape index: {}]   ;;  %s1252_s9 = inlined_call_operand.hbm [shape: f32[2,16], index: 9, kind: output, shape index: {0}]   ;;  %s1253_s10 = inlined_call_operand.hbm [shape: f32[2,8], index: 10, kind: output, shape index: {1}]  }
   0x1   :  { %18 = vsyncpa [#allocation5], 0 }
   0x2   :  { %19 = vsyncpa [#allocation8], 0  ;;  %s879_s13 = smov [#allocation3]   ;;  %s807_s17 = scalar_lea.hbm %s1247_s4, 4096 }
   0x3   :  { %s33_s14 = sshll.u32 %s879_s13, 4  ;;  %p808_p0 = scmp.ne.s32.totalorder %s1247_s4, %s807_s17  ;;  %s34_s14 = int_to_ptr.vmem [resolvable:$true] %s33_s14 }
   0x4   :  { %p811_p1 = scmp.lt.u32.totalorder %s807_s17, %s1247_s4 }
   0x6   :  { %p813_p2 = pnand %p811_p1, %p808_p0 }
   0x8   :  { %816 = shalt.err (!%p813_p2)
}
   0x9   :  { %s817_s22 = scalar_lea.vmem %s34_s14, 4096  ;;  %p822_p4 = scmp.lt.s32.totalorder %s34_s14, %s34_s14 }
   0xa   :  { %p818_p3 = scmp.ne.s32.totalorder %s34_s14, %s817_s22  ;;  %p823_p5 = scmp.lt.s32.totalorder %s817_s22, %s817_s22 }
   0xc   :  { %p824_p6 = por %p823_p5, %p822_p4 }
   0xe   :  { %p825_p7 = pnand %p824_p6, %p818_p3 }
  0x10   :  { %828 = shalt.err (!%p825_p7)
}
  0x11   :  { %s880_s23 = smov 256   ;;  %s881_s24 = smov 16  }
  0x12   :  { %39 = dma.hbm_to_vmem [thread:$0]  %s1247_s4, 4096, %s34_s14, [#allocation4], %s880_s23, %s880_s23, %s881_s24  }
  0x13   :  { %873 = dma.done.wait [#allocation4], 4096  }
  0x14   :  { %874 = vsyncadd [#allocation4], 4294963200  ;;  %v882_v0 = vmov 0.0   ;;  %v87_v1 = vld [vmem:[#allocation3 + $0x8] sm:$0xff]  ;;  %v89_v2 = vld [vmem:[#allocation3 + $0x18] sm:$0xff]  ;;  %vm367_vm0 = vcmask 58368  }
  0x15   :  { %182 = vmatprep.mubr.f32.mxu0 %v882_v0  ;;  %v86_v3 = vld [vmem:[#allocation3] sm:$0xff]  ;;  %v669_v4 = vpack.c.bf16 %v89_v2, %v87_v1  ;;  %v88_v5 = vld [vmem:[#allocation3 + $0x10] sm:$0xff]  ;;  %v91_v6 = vld [vmem:[#allocation3 + $0x28] sm:$0xff]  ;;  %vm883_vm1 = vmmov 0   ;;  %vm381_vm2 = vcmask 64512   ;;  %s885_s12 = smov [#allocation7]  }
  0x16   :  { %v93_v7 = vld [vmem:[#allocation3 + $0x38] sm:$0xff]  ;;  %v671_v8 = vpack.c.bf16 %v88_v5, %v86_v3  ;;  %v90_v10 = vld [vmem:[#allocation3 + $0x20] sm:$0xff]  ;;  %v92_v11 = vld [vmem:[#allocation3 + $0x30] sm:$0xff]  ;;  %s561_s13 = sshll.u32 %s885_s12, 4  ;;  %s562_s13 = int_to_ptr.vmem [resolvable:$true] %s561_s13 }
  0x17   :  { %v673_v9 = vpack.c.bf16 %v93_v7, %v91_v6  ;;  %v95_v12 = vld [vmem:[#allocation3 + $0x48] sm:$0xff]  ;;  %670 = vmatprep.subr.bf16.mxu0 %v669_v4  ;;  %v97_v13 = vld [vmem:[#allocation3 + $0x58] sm:$0xff]  ;;  %v675_v14 = vpack.c.bf16 %v92_v11, %v90_v10  ;;  %v94_v16 = vld [vmem:[#allocation3 + $0x40] sm:$0xff]  ;;  %s829_s14 = scalar_lea.vmem %s562_s13, 32  ;;  %p834_p9 = scmp.lt.s32.totalorder %s562_s13, %s562_s13 }
  0x18   :  { %672 = vmatpush1.bf16.msra.mxu0 %v671_v8  ;;  %v677_v15 = vpack.c.bf16 %v97_v13, %v95_v12  ;;  %v96_v17 = vld [vmem:[#allocation3 + $0x50] sm:$0xff]  ;;  %v99_v18 = vld [vmem:[#allocation3 + $0x68] sm:$0xff]  ;;  %v101_v19 = vld [vmem:[#allocation3 + $0x78] sm:$0xff]  ;;  %p830_p8 = scmp.ne.s32.totalorder %s562_s13, %s829_s14  ;;  %p835_p10 = scmp.lt.s32.totalorder %s829_s14, %s829_s14 }
  0x19   :  { %674 = vmatprep.subr.bf16.mxu0 %v673_v9  ;;  %v679_v20 = vpack.c.bf16 %v96_v17, %v94_v16  ;;  %v681_v21 = vpack.c.bf16 %v101_v19, %v99_v18  ;;  %v98_v22 = vld [vmem:[#allocation3 + $0x60] sm:$0xff]  ;;  %v100_v23 = vld [vmem:[#allocation3 + $0x70] sm:$0xff]  ;;  %v103_v24 = vld [vmem:[#allocation3 + $0x88] sm:$0xff] }
  0x1a   :  { %v105_v25 = vld [vmem:[#allocation3 + $0x98] sm:$0xff]  ;;  %v683_v26 = vpack.c.bf16 %v100_v23, %v98_v22  ;;  %v102_v28 = vld [vmem:[#allocation3 + $0x80] sm:$0xff]  ;;  %v104_v29 = vld [vmem:[#allocation3 + $0x90] sm:$0xff]  ;;  %p836_p11 = por %p835_p10, %p834_p9 }
  0x1b   :  { %v685_v27 = vpack.c.bf16 %v105_v25, %v103_v24  ;;  %v107_v30 = vld [vmem:[#allocation3 + $0xa8] sm:$0xff]  ;;  %v109_v31 = vld [vmem:[#allocation3 + $0xb8] sm:$0xff]  ;;  %v687_v32 = vpack.c.bf16 %v104_v29, %v102_v28  ;;  %v106_v34 = vld [vmem:[#allocation3 + $0xa0] sm:$0xff] }
  0x1c   :  { %676 = vmatpush1.bf16.msra.mxu0 %v675_v14  ;;  %v689_v33 = vpack.c.bf16 %v109_v31, %v107_v30  ;;  %v108_v35 = vld [vmem:[#allocation3 + $0xb0] sm:$0xff]  ;;  %v111_v36 = vld [vmem:[#allocation3 + $0xc8] sm:$0xff]  ;;  %v113_v37 = vld [vmem:[#allocation3 + $0xd8] sm:$0xff]  ;;  %p837_p12 = pnand %p836_p11, %p830_p8 }
  0x1d   :  { %678 = vmatprep.subr.bf16.mxu0 %v677_v15  ;;  %v691_v38 = vpack.c.bf16 %v108_v35, %v106_v34  ;;  %v110_v39 = vld [vmem:[#allocation3 + $0xc0] sm:$0xff]  ;;  %v693_v40 = vpack.c.bf16 %v113_v37, %v111_v36  ;;  %v112_v41 = vld [vmem:[#allocation3 + $0xd0] sm:$0xff]  ;;  %v115_v42 = vld [vmem:[#allocation3 + $0xe8] sm:$0xff] }
  0x1e   :  { %v117_v43 = vld [vmem:[#allocation3 + $0xf8] sm:$0xff]  ;;  %v281_v44 = vld [vmem:[%s1248_s5 + $0x80] sm:$0xff]  ;;  %v282_v45 = vld [vmem:[%s1248_s5 + $0x88] sm:$0xff]  ;;  %v695_v51 = vpack.c.bf16 %v112_v41, %v110_v39 }
  0x1f   :  { %v265_v46 = vld [vmem:[%s1248_s5] sm:$0xff]  ;;  %v733_v47 = vpack.c.bf16 %v282_v45, %v281_v44  ;;  %v266_v48 = vld [vmem:[%s1248_s5 + $0x8] sm:$0xff]  ;;  %v283_v49 = vld [vmem:[%s1248_s5 + $0x90] sm:$0xff]  ;;  %v697_v57 = vpack.c.bf16 %v117_v43, %v115_v42 }
  0x20   :  { %680 = vmatpush1.bf16.msra.mxu0 %v679_v20  ;;  %v284_v50 = vld [vmem:[%s1248_s5 + $0x98] sm:$0xff]  ;;  %v735_v52 = vpack.c.bf16 %v266_v48, %v265_v46  ;;  %v267_v54 = vld [vmem:[%s1248_s5 + $0x10] sm:$0xff]  ;;  %v285_v56 = vld [vmem:[%s1248_s5 + $0xa0] sm:$0xff] }
  0x21   :  { %682 = vmatprep.subr.bf16.mxu0 %v681_v21  ;;  %v737_v53 = vpack.c.bf16 %v284_v50, %v283_v49  ;;  %v268_v55 = vld [vmem:[%s1248_s5 + $0x18] sm:$0xff]  ;;  %v114_v58 = vld [vmem:[#allocation3 + $0xe0] sm:$0xff]  ;;  %v116_v59 = vld [vmem:[#allocation3 + $0xf0] sm:$0xff]  ;;  %734 = vmatprep.subr.bf16.mxu1 %v733_v47 }
  0x22   :  { %v286_v60 = vld [vmem:[%s1248_s5 + $0xa8] sm:$0xff]  ;;  %v56_v62 = vld [vmem:[%s1246_s3 + $0x18] sm:$0xff]  ;;  %736 = vmatpush3.bf16.msra.mxu1 %v735_v52  ;;  %v739_v63 = vpack.c.bf16 %v268_v55, %v267_v54  ;;  %v269_v2 = vld [vmem:[%s1248_s5 + $0x20] sm:$0xff]  ;;  %v699_v4 = vpack.c.bf16 %v116_v59, %v114_v58 }
  0x23   :  { %v54_v61 = vld [vmem:[%s1246_s3 + $0x8] sm:$0xff]  ;;  %738 = vmatprep.subr.bf16.mxu1 %v737_v53  ;;  %v741_v1 = vpack.c.bf16 %v286_v60, %v285_v56  ;;  %v287_v5 = vld [vmem:[%s1248_s5 + $0xb0] sm:$0xff]  ;;  %v288_v6 = vld [vmem:[%s1248_s5 + $0xb8] sm:$0xff] }
  0x24   :  { %684 = vmatpush1.bf16.msra.mxu0 %v683_v26  ;;  %v270_v3 = vld [vmem:[%s1248_s5 + $0x28] sm:$0xff]  ;;  %v701_v7 = vpack.c.bf16 %v56_v62, %v54_v61  ;;  %v53_v8 = vld [vmem:[%s1246_s3] sm:$0xff]  ;;  %v55_v9 = vld [vmem:[%s1246_s3 + $0x10] sm:$0xff]  ;;  %v745_v13 = vpack.c.bf16 %v288_v6, %v287_v5 }
  0x25   :  { %686 = vmatprep.subr.bf16.mxu0 %v685_v27  ;;  %v58_v10 = vld [vmem:[%s1246_s3 + $0x28] sm:$0xff]  ;;  %v60_v11 = vld [vmem:[%s1246_s3 + $0x38] sm:$0xff]  ;;  %v743_v12 = vpack.c.bf16 %v270_v3, %v269_v2  ;;  %v271_v14 = vld [vmem:[%s1248_s5 + $0x30] sm:$0xff]  ;;  %v703_v17 = vpack.c.bf16 %v55_v9, %v53_v8 }
  0x26   :  { %740 = vmatpush3.bf16.msra.mxu1 %v739_v63  ;;  %v272_v15 = vld [vmem:[%s1248_s5 + $0x38] sm:$0xff]  ;;  %v85_v16 = vld [vmem:[%s1244_s1] sm:$0x3]  ;;  %v705_v18 = vpack.c.bf16 %v60_v11, %v58_v10  ;;  %v59_v20 = vld [vmem:[%s1246_s3 + $0x30] sm:$0xff] }
  0x27   :  { %742 = vmatprep.subr.bf16.mxu1 %v741_v1  ;;  %v57_v19 = vld [vmem:[%s1246_s3 + $0x20] sm:$0xff]  ;;  %v62_v21 = vld [vmem:[%s1246_s3 + $0x48] sm:$0xff]  ;;  %v64_v22 = vld [vmem:[%s1246_s3 + $0x58] sm:$0xff]  ;;  %v747_v23 = vpack.c.bf16 %v272_v15, %v271_v14 }
  0x28   :  { %688 = vmatpush1.bf16.msra.mxu0 %v687_v32  ;;  %v707_v24 = vpack.c.bf16 %v59_v20, %v57_v19  ;;  %v709_v25 = vpack.c.bf16 %v64_v22, %v62_v21  ;;  %v61_v26 = vld [vmem:[%s1246_s3 + $0x40] sm:$0xff]  ;;  %v63_v27 = vld [vmem:[%s1246_s3 + $0x50] sm:$0xff]  ;;  %v66_v28 = vld [vmem:[%s1246_s3 + $0x68] sm:$0xff]  ;;  %v260_v21 = vstv %s1251_s8 }
  0x29   :  { %690 = vmatprep.subr.bf16.mxu0 %v689_v33  ;;  %v68_v29 = vld [vmem:[%s1246_s3 + $0x78] sm:$0xff]  ;;  %v711_v30 = vpack.c.bf16 %v63_v27, %v61_v26  ;;  %v65_v32 = vld [vmem:[%s1246_s3 + $0x60] sm:$0xff]  ;;  %v67_v33 = vld [vmem:[%s1246_s3 + $0x70] sm:$0xff] }
  0x2a   :  { %744 = vmatpush3.bf16.msra.mxu1 %v743_v12  ;;  %v713_v31 = vpack.c.bf16 %v68_v29, %v66_v28  ;;  %v70_v34 = vld [vmem:[%s1246_s3 + $0x88] sm:$0xff]  ;;  %v72_v35 = vld [vmem:[%s1246_s3 + $0x98] sm:$0xff]  ;;  %v715_v36 = vpack.c.bf16 %v67_v33, %v65_v32  ;;  %v71_v39 = vld [vmem:[%s1246_s3 + $0x90] sm:$0xff] }
  0x2b   :  { %746 = vmatprep.subr.bf16.mxu1 %v745_v13  ;;  %v717_v37 = vpack.c.bf16 %v72_v35, %v70_v34  ;;  %v76_v41 = vld [vmem:[%s1246_s3 + $0xb8] sm:$0xff]  ;;  %v73_v44 = vld [vmem:[%s1246_s3 + $0xa0] sm:$0xff]  ;;  %v75_v45 = vld [vmem:[%s1246_s3 + $0xb0] sm:$0xff] }
  0x2c   :  { %692 = vmatpush1.bf16.msra.mxu0 %v691_v38  ;;  %v69_v38 = vld [vmem:[%s1246_s3 + $0x80] sm:$0xff]  ;;  %v78_v46 = vld [vmem:[%s1246_s3 + $0xc8] sm:$0xff]  ;;  %v80_v47 = vld [vmem:[%s1246_s3 + $0xd8] sm:$0xff]  ;;  %v723_v48 = vpack.c.bf16 %v75_v45, %v73_v44 }
  0x2d   :  { %694 = vmatprep.subr.bf16.mxu0 %v693_v40  ;;  %v74_v40 = vld [vmem:[%s1246_s3 + $0xa8] sm:$0xff]  ;;  %v719_v42 = vpack.c.bf16 %v71_v39, %v69_v38  ;;  %v725_v49 = vpack.c.bf16 %v80_v47, %v78_v46  ;;  %v77_v50 = vld [vmem:[%s1246_s3 + $0xc0] sm:$0xff]  ;;  %v84_v53 = vld [vmem:[%s1246_s3 + $0xf8] sm:$0xff]  ;;  %v884_v38 = vmov 0.0|0.0  }
  0x2e   :  { %748 = vmatpush3.bf16.msra.mxu1 %v747_v23  ;;  %v721_v43 = vpack.c.bf16 %v76_v41, %v74_v40  ;;  %v82_v52 = vld [vmem:[%s1246_s3 + $0xe8] sm:$0xff]  ;;  %v81_v56 = vld [vmem:[%s1246_s3 + $0xe0] sm:$0xff]  ;;  %v291_v3 = vld [vmem:[%s1248_s5 + $0xd0] sm:$0xff] }
  0x2f   :  { %v729_v55 = vpack.c.bf16 %v84_v53, %v82_v52  ;;  %v52_v59 = vld [vmem:[%s1243_s0] sm:$0x3]  ;;  %v290_v61 = vld [vmem:[%s1248_s5 + $0xc8] sm:$0xff]  ;;  %v275_v6 = vld [vmem:[%s1248_s5 + $0x50] sm:$0xff] }
  0x30   :  { %696 = vmatpush1.bf16.msra.mxu0 %v695_v51  ;;  %v79_v51 = vld [vmem:[%s1246_s3 + $0xd0] sm:$0xff]  ;;  %v289_v60 = vld [vmem:[%s1248_s5 + $0xc0] sm:$0xff]  ;;  %v274_v1 = vld [vmem:[%s1248_s5 + $0x48] sm:$0xff] }
  0x31   :  { %698 = vmatprep.subr.bf16.mxu0 %v697_v57  ;;  %v727_v54 = vpack.c.bf16 %v79_v51, %v77_v50  ;;  %v83_v57 = vld [vmem:[%s1246_s3 + $0xf0] sm:$0xff]  ;;  %v749_v62 = vpack.c.bf16 %v290_v61, %v289_v60  ;;  %v273_v63 = vld [vmem:[%s1248_s5 + $0x40] sm:$0xff]  ;;  %v294_v10 = vld [vmem:[%s1248_s5 + $0xe8] sm:$0xff] }
  0x32   :  { %v731_v58 = vpack.c.bf16 %v83_v57, %v81_v56  ;;  %v751_v2 = vpack.c.bf16 %v274_v1, %v273_v63  ;;  %v293_v9 = vld [vmem:[%s1248_s5 + $0xe0] sm:$0xff]  ;;  %v278_v13 = vld [vmem:[%s1248_s5 + $0x68] sm:$0xff]  ;;  %v295_v14 = vld [vmem:[%s1248_s5 + $0xf0] sm:$0xff] }
  0x33   :  { %750 = vmatprep.subr.bf16.mxu1 %v749_v62  ;;  %v277_v11 = vld [vmem:[%s1248_s5 + $0x60] sm:$0xff]  ;;  %v757_v12 = vpack.c.bf16 %v294_v10, %v293_v9  ;;  %v296_v15 = vld [vmem:[%s1248_s5 + $0xf8] sm:$0xff]  ;;  %v458_v41 = vld [vmem:[%s1250_s7 + $0x8] sm:$0xff] }
  0x34   :  { %700 = vmatpush1.bf16.msra.mxu0 %v699_v4  ;;  %752 = vmatpush3.bf16.msra.mxu1 %v751_v2  ;;  %v292_v4 = vld [vmem:[%s1248_s5 + $0xd8] sm:$0xff]  ;;  %v457_v40 = vld [vmem:[%s1250_s7] sm:$0xff]  ;;  %v459_v45 = vld [vmem:[%s1250_s7 + $0x10] sm:$0xff] }
  0x35   :  { %702 = vmatprep.subr.bf16.mxu0 %v701_v7  ;;  %v753_v5 = vpack.c.bf16 %v292_v4, %v291_v3  ;;  %v276_v7 = vld [vmem:[%s1248_s5 + $0x58] sm:$0xff]  ;;  %v463_v51 = vld [vmem:[%s1250_s7 + $0x30] sm:$0xff]  ;;  %v465_v53 = vld [vmem:[%s1250_s7 + $0x40] sm:$0xff] }
  0x36   :  { %v755_v8 = vpack.c.bf16 %v276_v7, %v275_v6  ;;  %v280_v19 = vld [vmem:[%s1248_s5 + $0x78] sm:$0xff]  ;;  %v467_v56 = vld [vmem:[%s1250_s7 + $0x50] sm:$0xff]  ;;  %v470_v60 = vld [vmem:[%s1250_s7 + $0x68] sm:$0xff] }
  0x37   :  { %183 = vmatmul.mubr.f32.vlgmr.msra.gmra.mrb[0].mxu0 %v85_v16  ;;  %754 = vmatprep.subr.bf16.mxu1 %v753_v5  ;;  %v759_v16 = vpack.c.bf16 %v278_v13, %v277_v11  ;;  %v460_v46 = vld [vmem:[%s1250_s7 + $0x18] sm:$0xff]  ;;  %v471_v62 = vld [vmem:[%s1250_s7 + $0x70] sm:$0xff]  ;;  %v455_v2 = vld [vmem:[%s1245_s2] sm:$0x3] }
  0x38   :  { %704 = vmatpush1.bf16.msra.mxu0 %v703_v17  ;;  %253 = vmatprep.mubr.f32.mxu0 %v882_v0  ;;  %v761_v17 = vpack.c.bf16 %v296_v15, %v295_v14  ;;  %v769_v47 = vpack.c.bf16 %v460_v46, %v459_v45  ;;  %v468_v57 = vld [vmem:[%s1250_s7 + $0x58] sm:$0xff] }
  0x39   :  { %706 = vmatprep.subr.bf16.mxu0 %v705_v18  ;;  %756 = vmatpush3.bf16.msra.mxu1 %v755_v8  ;;  %v279_v18 = vld [vmem:[%s1248_s5 + $0x70] sm:$0xff]  ;;  %v472_v63 = vld [vmem:[%s1250_s7 + $0x78] sm:$0xff] }
  0x3a   :  { %758 = vmatprep.subr.bf16.mxu1 %v757_v12  ;;  %v763_v20 = vpack.c.bf16 %v280_v19, %v279_v18  ;;  %v787_v1 = vpack.c.bf16 %v472_v63, %v471_v62 }
  0x3c   :  { %708 = vmatpush1.bf16.msra.mxu0 %v707_v24 }
  0x3d   :  { %710 = vmatprep.subr.bf16.mxu0 %v709_v25  ;;  %760 = vmatpush3.bf16.msra.mxu1 %v759_v16 }
  0x3e   :  { %762 = vmatprep.subr.bf16.mxu1 %v761_v17 }
  0x40   :  { %712 = vmatpush1.bf16.msra.mxu0 %v711_v30 }
  0x41   :  { %714 = vmatprep.subr.bf16.mxu0 %v713_v31  ;;  %764 = vmatpush3.bf16.msra.mxu1 %v763_v20 }
  0x42   :  { %629 = vmatprep.subr.mxu1 %v882_v0 }
  0x44   :  { %716 = vmatpush1.bf16.msra.mxu0 %v715_v36 }
  0x45   :  { %718 = vmatprep.subr.bf16.mxu0 %v717_v37  ;;  %v380_v37 = vld [vmem:[%s1249_s6] sm:$0xff] }
  0x48   :  { %720 = vmatpush1.bf16.msra.mxu0 %v719_v42 }
  0x49   :  { %722 = vmatprep.subr.bf16.mxu0 %v721_v43  ;;  %v766_v43 = vpack.c.bf16 %v458_v41, %v457_v40 }
  0x4c   :  { %724 = vmatpush1.bf16.msra.mxu0 %v723_v48  ;;  %v461_v48 = vld [vmem:[%s1250_s7 + $0x20] sm:$0xff] }
  0x4d   :  { %726 = vmatprep.subr.bf16.mxu0 %v725_v49  ;;  %v462_v49 = vld [vmem:[%s1250_s7 + $0x28] sm:$0xff] }
  0x4e   :  { %v772_v50 = vpack.c.bf16 %v462_v49, %v461_v48 }
  0x50   :  { %728 = vmatpush1.bf16.msra.mxu0 %v727_v54  ;;  %v466_v54 = vld [vmem:[%s1250_s7 + $0x48] sm:$0xff] }
  0x51   :  { %730 = vmatprep.subr.bf16.mxu0 %v729_v55  ;;  %v778_v55 = vpack.c.bf16 %v466_v54, %v465_v53 }
  0x54   :  { %732 = vmatpush1.bf16.msra.mxu0 %v731_v58  ;;  %v781_v58 = vpack.c.bf16 %v468_v57, %v467_v56 }
  0x57   :  { %254 = vmatmul.mubr.f32.vlgmr.msra.gmra.mrb[0].mxu0 %v52_v59  ;;  %v469_v59 = vld [vmem:[%s1250_s7 + $0x60] sm:$0xff] }
  0x58   :  { %v784_v61 = vpack.c.bf16 %v470_v60, %v469_v59 }
 0x12a   :  { %v255_v22 = vpop.f32.mrb[0].mxu0 }
 0x12b   :  { %v261_v23 = vadd.f32 %v260_v21, %v255_v22  ;;  %v257_v24 = vpop.f32.mrb[1].mxu0 }
 0x12c   :  { %v262_v25 = vadd.f32 %v260_v21, %v257_v24 }
 0x12e   :  { %799 = vtanh.f32 %v262_v25 }
 0x12f   :  { %801 = vtanh.f32 %v261_v23 }
 0x138   :  { %v800_v26 = vpop.eup %799 }
 0x139   :  { %v802_v27 = vpop.eup %801  ;;  %361 = vmatprep.mubr.f32.mxu1 %v800_v26 }
 0x13a   :  { %362 = vmatmul.mubr.f32.vlgmr.msra.gmra.mrb[0].mxu1 %v802_v27 }
 0x13b   :  { %630 = vmatpush3.msra.mxu1 %v380_v37  ;;  %631 = vmatprep.mubr.msk.f32.mxu1 %vm883_vm1, %v882_v0 }
 0x13c   :  { %765 = vmatprep.subr.bf16.mxu1 %v884_v38 }
 0x20d   :  { %v607_v28 = vpop.f32.mrb[0].mxu1 }
 0x20e   :  { %v608_v29 = vpop.f32.mrb[1].mxu1 }
 0x20f   :  { %v609_v30 = vadd.f32 %v608_v29, %v607_v28 }
 0x211   :  { %v368_v31 = vsel %vm367_vm0, %v609_v30, -inf }
 0x212   :  { %369 = vmax.xlane.f32.xlu0 %v368_v31 }
 0x29f   :  { %v370_v32 = vpop.xlane.xlu0 %369 }
 0x2a0   :  { %v371_v33 = vsub.f32 %v609_v30, %v370_v32 }
 0x2a2   :  { %v372_v34 = vmul.f32 1.442695, %v371_v33 }
 0x2a4   :  { %803 = vpow2.f32 %v372_v34 }
 0x2ae   :  { %v804_v35 = vpop.eup %803 }
 0x2af   :  { %v374_v36 = vsel %vm367_vm0, %v804_v35, 0.0 }
 0x2b0   :  { %375 = vadd.xlane.f32.xlu0 %v374_v36 }
 0x33d   :  { %v376_v39 = vpop.xlane.xlu0 %375 }
 0x33e   :  { %805 = vrcp.f32 %v376_v39 }
 0x348   :  { %v806_v42 = vpop.eup %805 }
 0x349   :  { %v378_v44 = vmul.f32 %v806_v42, %v804_v35 }
 0x34b   :  { %379 = vst.msk [vmem:[#allocation7] sm:$0x3] %vm367_vm0, %v378_v44  ;;  %632 = vmatmul.mubr.msk.f32.vlgmr.msra.gmra.mrb[2].mxu1 %vm381_vm2, %v378_v44 }
 0x34c   :  { %767 = vmatpush3.bf16.msra.mxu1 %v766_v43  ;;  %666 = vmatprep.mubr.msk.f32.mxu1 %vm883_vm1, %v882_v0  ;;  %v464_v0 = vld [vmem:[%s1250_s7 + $0x38] sm:$0xff] }
 0x34d   :  { %768 = vmatprep.subr.bf16.mxu1 %v884_v38  ;;  %v775_v52 = vpack.c.bf16 %v464_v0, %v463_v51 }
 0x350   :  { %770 = vmatpush3.bf16.msra.mxu1 %v769_v47 }
 0x351   :  { %771 = vmatprep.subr.bf16.mxu1 %v884_v38 }
 0x354   :  { %773 = vmatpush3.bf16.msra.mxu1 %v772_v50 }
 0x355   :  { %774 = vmatprep.subr.bf16.mxu1 %v884_v38 }
 0x358   :  { %776 = vmatpush3.bf16.msra.mxu1 %v775_v52 }
 0x359   :  { %777 = vmatprep.subr.bf16.mxu1 %v884_v38 }
 0x35c   :  { %779 = vmatpush3.bf16.msra.mxu1 %v778_v55 }
 0x35d   :  { %780 = vmatprep.subr.bf16.mxu1 %v884_v38 }
 0x360   :  { %782 = vmatpush3.bf16.msra.mxu1 %v781_v58 }
 0x361   :  { %783 = vmatprep.subr.bf16.mxu1 %v884_v38 }
 0x364   :  { %785 = vmatpush3.bf16.msra.mxu1 %v784_v61 }
 0x365   :  { %786 = vmatprep.subr.bf16.mxu1 %v884_v38 }
 0x368   :  { %788 = vmatpush3.bf16.msra.mxu1 %v787_v1 }
 0x41e   :  { %v451_v3 = vpop.f32.mrb[2].mxu1 }
 0x41f   :  { %v456_v4 = vmul.f32 %v455_v2, %v451_v3  ;;  %v633_v5 = vpop.f32.mrb[3].mxu1 }
 0x421   :  { %667 = vmatmul.mubr.f32.vlgmr.msra.gmra.mrb[4].mxu1 %v456_v4 }
 0x422   :  { %840 = shalt.err (!%p837_p12)
}
 0x423   :  { %s841_s16 = scalar_lea.hbm %s1253_s10, 32 }
 0x424   :  { %p842_p13 = scmp.ne.s32.totalorder %s1253_s10, %s841_s16  ;;  %p845_p0 = scmp.lt.u32.totalorder %s841_s16, %s1253_s10 }
 0x426   :  { %p847_p1 = pnand %p845_p0, %p842_p13 }
 0x428   :  { %850 = shalt.err (!%p847_p1)
}
 0x429   :  { %564 = dma.vmem_to_hbm [thread:$0]  %s562_s13, 32, %s1253_s10, [#allocation8]   ;;  %vm543_vm3 = vcmask 123904  }
 0x42a   :  { %s886_s21 = smov [#allocation6]  }
 0x42b   :  { %s551_s22 = sshll.u32 %s886_s21, 4  ;;  %s552_s22 = int_to_ptr.vmem [resolvable:$true] %s551_s22 }
 0x42c   :  { %s851_s23 = scalar_lea.vmem %s552_s22, 32  ;;  %p856_p3 = scmp.lt.s32.totalorder %s552_s22, %s552_s22 }
 0x42d   :  { %p852_p2 = scmp.ne.s32.totalorder %s552_s22, %s851_s23  ;;  %p857_p4 = scmp.lt.s32.totalorder %s851_s23, %s851_s23 }
 0x42f   :  { %p858_p5 = por %p857_p4, %p856_p3 }
 0x431   :  { %p859_p6 = pnand %p858_p5, %p852_p2 }
 0x4f4   :  { %v539_v6 = vpop.f32.mrb[4].mxu1 }
 0x4f5   :  { %v668_v7 = vpop.f32.mrb[5].mxu1  ;;  %544 = vst.msk [vmem:[#allocation6] sm:$0x3] %vm543_vm3, %v539_v6 }
 0x4f6   :  { %862 = shalt.err (!%p859_p6)
}
 0x4f7   :  { %s863_s25 = scalar_lea.hbm %s1252_s9, 32 }
 0x4f8   :  { %p864_p7 = scmp.ne.s32.totalorder %s1252_s9, %s863_s25  ;;  %p867_p8 = scmp.lt.u32.totalorder %s863_s25, %s1252_s9 }
 0x4fa   :  { %p869_p9 = pnand %p867_p8, %p864_p7 }
 0x4fc   :  { %872 = shalt.err (!%p869_p9)
}
 0x4fd   :  { %554 = dma.vmem_to_hbm [thread:$0]  %s552_s22, 32, %s1252_s9, [#allocation5]  }
 0x4fe   :  { %875 = dma.done.wait [#allocation5], 32  }
 0x4ff   :  { %876 = vsyncadd [#allocation5], 4294967264 }
 0x500   :  { %877 = dma.done.wait [#allocation8], 32  }
 0x501   :  { %878 = vsyncadd [#allocation8], 4294967264 }
 0x502   :  { %571 = vsyncpa [#allocation4], 1 }
 0x503   :  { %572 = vsyncpa [#allocation5], 1 }
 0x504   :  { %573 = vsyncpa [#allocation8], 1 }

</bundles_post_ra>
